<compile_context>
chip_gen: v7x
topology: tpu7x:2x2x1
jax: 0.10.0
libtpu: 0.0.40
codegen_flags: <defaults>
</compile_context>

<pallas_src>
import functools

import jax
import jax.numpy as jnp
from jax.experimental import pallas as pl
from jax.experimental.pallas import tpu as pltpu


def embed_kernel(x_ref, w1_ref, b1_ref, w2_ref, b2_ref, w3_ref, b3_ref, o_ref,
                 *, act_dtype):
    # Fused 3-layer MLP on one batch tile.
    # x arrives f32 and is cast to bf16 in VMEM (MXU-native operands),
    # accumulation + bias add in f32, sigmoid chain in `act_dtype`.
    x = x_ref[...].astype(jnp.bfloat16)

    z1 = jnp.dot(x, w1_ref[...], preferred_element_type=jnp.float32) + b1_ref[...]
    h1 = jax.nn.sigmoid(z1.astype(act_dtype))

    z2 = jnp.dot(h1.astype(jnp.bfloat16), w2_ref[...],
                 preferred_element_type=jnp.float32) + b2_ref[...]
    h2 = jax.nn.sigmoid(z2.astype(act_dtype))

    z3 = jnp.dot(h2.astype(jnp.bfloat16), w3_ref[...],
                 preferred_element_type=jnp.float32) + b3_ref[...]
    h3 = jax.nn.sigmoid(z3.astype(act_dtype))

    o_ref[...] = h3.astype(o_ref.dtype)


def _cdiv(a, m):
    return (a + m - 1) // m


def _round_up(a, m):
    return _cdiv(a, m) * m


def _default_activation_dtype():
    # bf16 VPU/EUP exists on v6e / v7x; v5e and earlier lack it -> keep f32.
    try:
        kind = jax.devices()[0].device_kind.lower()
    except Exception:
        return jnp.float32
    if "v6" in kind or "v7" in kind:
        return jnp.bfloat16
    return jnp.float32


def prepare_params(params):
    """One-time parameter prep: bf16 MXU weights, f32 [1, out] bias rows."""
    w1, b1, w2, b2, w3, b3 = params
    row = lambda b: jnp.asarray(b, jnp.float32).reshape(1, -1)
    return (jnp.asarray(w1, jnp.bfloat16), row(b1),
            jnp.asarray(w2, jnp.bfloat16), row(b2),
            jnp.asarray(w3, jnp.bfloat16), row(b3))


def embed_forward(x, prepared_params, *, tb_max=2048, activation_dtype=None):
    """x: [B, in_features] float32. Returns [B, 64] float32."""
    w1, b1, w2, b2, w3, b3 = prepared_params
    B, F = x.shape
    h1_dim = w1.shape[1]   # 256
    h2_dim = w2.shape[1]   # 128
    out_dim = w3.shape[1]  # 64

    if activation_dtype is None:
        activation_dtype = _default_activation_dtype()

    # Cap the tile so the double-buffered f32 x tile stays under ~8 MiB
    # (safe within default scoped VMEM on v5e/v6e and v7x's 64 MiB physical).
    x_row_bytes = F * 4
    tb_cap = max(8, ((8 << 20) // (2 * x_row_bytes)) // 8 * 8)
    tb_max = min(tb_max, tb_cap)

    # Balanced tiles (pad waste < 8 rows per tile); for mid/large single-tile
    # batches force >= 2 grid steps so both v7x TensorCores get work.
    n_tiles = max(1, _cdiv(B, tb_max))
    if n_tiles == 1 and B >= 512:
        n_tiles = 2
    tb = _round_up(_cdiv(B, n_tiles), 8)
    Bp = tb * n_tiles
    if Bp != B:
        x = jnp.pad(x, ((0, Bp - B), (0, 0)))

    flops = 2 * Bp * (F * h1_dim + h1_dim * h2_dim + h2_dim * out_dim)
    transcendentals = Bp * (h1_dim + h2_dim + out_dim)
    bytes_accessed = (Bp * F * 4 + Bp * out_dim * 4
                      + (F * h1_dim + h1_dim * h2_dim + h2_dim * out_dim) * 2
                      + (h1_dim + h2_dim + out_dim) * 4)
    cost = pl.CostEstimate(flops=flops, transcendentals=transcendentals,
                           bytes_accessed=bytes_accessed)

    out = pl.pallas_call(
        functools.partial(embed_kernel, act_dtype=activation_dtype),
        out_shape=jax.ShapeDtypeStruct((Bp, out_dim), jnp.float32),
        grid=(n_tiles,),
        in_specs=[
            pl.BlockSpec((tb, F), lambda i: (i, 0)),       # x: tiled on batch
            pl.BlockSpec(w1.shape, lambda i: (0, 0)),      # weights / biases:
            pl.BlockSpec(b1.shape, lambda i: (0, 0)),      # resident across grid
            pl.BlockSpec(w2.shape, lambda i: (0, 0)),
            pl.BlockSpec(b2.shape, lambda i: (0, 0)),
            pl.BlockSpec(w3.shape, lambda i: (0, 0)),
            pl.BlockSpec(b3.shape, lambda i: (0, 0)),
        ],
        out_specs=pl.BlockSpec((tb, out_dim), lambda i: (i, 0)),
        compiler_params=pltpu.CompilerParams(
            dimension_semantics=("parallel",),   # megacore sharding on v7x
        ),
        cost_estimate=cost,
    )(x, w1, b1, w2, b2, w3, b3)

    return out if Bp == B else out[:B]


def xavier_uniform(key, fan_in, fan_out, dtype=jnp.float32):
    # Matches torch.nn.init.xavier_uniform_ (gain=1).
    limit = jnp.sqrt(6.0 / (fan_in + fan_out))
    # Stored as [in, out] (transpose of PyTorch's [out, in]) for x @ W.
    return jax.random.uniform(
        key, (fan_in, fan_out), dtype=dtype, minval=-limit, maxval=limit
    )


def linear_bias(key, fan_in, fan_out, dtype=jnp.float32):
    # PyTorch default Linear bias init: U(-1/sqrt(fan_in), 1/sqrt(fan_in)).
    bound = 1.0 / jnp.sqrt(float(fan_in))
    return jax.random.uniform(
        key, (1, fan_out), dtype=dtype, minval=-bound, maxval=bound
    )


def init_params(key, in_features):
    dims = [(in_features, 256), (256, 128), (128, 64)]
    params = []
    for fan_in, fan_out in dims:
        key, kw, kb = jax.random.split(key, 3)
        params.append(xavier_uniform(kw, fan_in, fan_out))
        params.append(linear_bias(kb, fan_in, fan_out))
    return tuple(params)


def embed_reference(x, params):
    # Pure-JAX f32 reference of the PyTorch forward.
    w1, b1, w2, b2, w3, b3 = params
    h1 = jax.nn.sigmoid(x @ w1 + b1)
    h2 = jax.nn.sigmoid(h1 @ w2 + b2)
    h3 = jax.nn.sigmoid(h2 @ w3 + b3)
    return h3


# TODO(synk): self.out = Linear(64, 1) exists on the PyTorch module but is not
# used in forward(), so it is intentionally omitted here.

if __name__ == "__main__":
    key = jax.random.PRNGKey(0)
    batch, in_features = 8, 32

    key, kx = jax.random.split(key)
    x = jax.random.normal(kx, (batch, in_features), dtype=jnp.float32)
    params = init_params(key, in_features)
    prepared = prepare_params(params)   # one-time bf16 weight prep

    out = embed_forward(x, prepared)
    out = jax.block_until_ready(out)

    ref = embed_reference(x, params)
    assert out.shape == (batch, 64)
    # bf16 MXU operands (and bf16 sigmoid chain on v6e/v7x) with f32
    # accumulation => small deviation from the pure-f32 reference.
    assert jnp.allclose(out, ref, atol=3e-2, rtol=3e-2), (
        float(jnp.max(jnp.abs(out - ref)))
    )

    print("KERNEL_OK")
</pallas_src>

<mosaic_0001>
module attributes {stable_mosaic.version = 11 : i64} {
  func.func @embed_kernel(%arg0: i32, %arg1: memref<8x32xf32, #tpu.memory_space<vmem>>, %arg2: memref<32x256xbf16, #tpu.memory_space<vmem>>, %arg3: memref<1x256xf32, #tpu.memory_space<vmem>>, %arg4: memref<256x128xbf16, #tpu.memory_space<vmem>>, %arg5: memref<1x128xf32, #tpu.memory_space<vmem>>, %arg6: memref<128x64xbf16, #tpu.memory_space<vmem>>, %arg7: memref<1x64xf32, #tpu.memory_space<vmem>>, %arg8: memref<8x64xf32, #tpu.memory_space<vmem>>) attributes {dimension_semantics = [#tpu.dimension_semantics<parallel>], iteration_bounds = array<i64: 1>, scalar_prefetch = 0 : i64, scratch_operands = 0 : i64, tpu.core_type = #tpu.core_type<tc>, window_params = [{transform_indices = @transform_0, window_bounds = array<i64: 8, 32>}, {pipeline_mode = #tpu.pipeline_mode<synchronous>, transform_indices = @transform_1, window_bounds = array<i64: 32, 256>}, {pipeline_mode = #tpu.pipeline_mode<synchronous>, transform_indices = @transform_2, window_bounds = array<i64: 1, 256>}, {pipeline_mode = #tpu.pipeline_mode<synchronous>, transform_indices = @transform_3, window_bounds = array<i64: 256, 128>}, {pipeline_mode = #tpu.pipeline_mode<synchronous>, transform_indices = @transform_4, window_bounds = array<i64: 1, 128>}, {pipeline_mode = #tpu.pipeline_mode<synchronous>, transform_indices = @transform_5, window_bounds = array<i64: 128, 64>}, {pipeline_mode = #tpu.pipeline_mode<synchronous>, transform_indices = @transform_6, window_bounds = array<i64: 1, 64>}, {transform_indices = @transform_7, window_bounds = array<i64: 8, 64>}]} {
    %c0 = arith.constant 0 : index
    %c0_0 = arith.constant 0 : index
    %0 = vector.load %arg1[%c0, %c0_0] : memref<8x32xf32, #tpu.memory_space<vmem>>, vector<8x32xf32>
    %1 = arith.truncf %0 : vector<8x32xf32> to vector<8x32xbf16>
    %c0_1 = arith.constant 0 : index
    %c0_2 = arith.constant 0 : index
    %2 = vector.load %arg2[%c0_1, %c0_2] : memref<32x256xbf16, #tpu.memory_space<vmem>>, vector<32x256xbf16>
    %cst = arith.constant dense<0.000000e+00> : vector<8x256xf32>
    %3 = tpu.matmul %1, %2, %cst {dimension_numbers = #tpu.dot_dimension_numbers<[1], [0], [0], [1], [0, 0, 1, 1], [], []>} : vector<8x32xbf16>, vector<32x256xbf16>, vector<8x256xf32> -> vector<8x256xf32>
    %c0_3 = arith.constant 0 : index
    %c0_4 = arith.constant 0 : index
    %4 = vector.load %arg3[%c0_3, %c0_4] : memref<1x256xf32, #tpu.memory_space<vmem>>, vector<1x256xf32>
    %5 = vector.broadcast %4 : vector<1x256xf32> to vector<8x256xf32>
    %6 = arith.addf %3, %5 : vector<8x256xf32>
    %7 = arith.negf %6 : vector<8x256xf32>
    %8 = math.exp %7 : vector<8x256xf32>
    %cst_5 = arith.constant 1.000000e+00 : f32
    %9 = vector.broadcast %cst_5 : f32 to vector<8x256xf32>
    %10 = arith.addf %9, %8 : vector<8x256xf32>
    %11 = arith.divf %9, %10 : vector<8x256xf32>
    %12 = arith.truncf %11 : vector<8x256xf32> to vector<8x256xbf16>
    %c0_6 = arith.constant 0 : index
    %c0_7 = arith.constant 0 : index
    %13 = vector.load %arg4[%c0_6, %c0_7] : memref<256x128xbf16, #tpu.memory_space<vmem>>, vector<256x128xbf16>
    %cst_8 = arith.constant dense<0.000000e+00> : vector<8x128xf32>
    %14 = tpu.matmul %12, %13, %cst_8 {dimension_numbers = #tpu.dot_dimension_numbers<[1], [0], [0], [1], [0, 0, 1, 1], [], []>} : vector<8x256xbf16>, vector<256x128xbf16>, vector<8x128xf32> -> vector<8x128xf32>
    %c0_9 = arith.constant 0 : index
    %c0_10 = arith.constant 0 : index
    %15 = vector.load %arg5[%c0_9, %c0_10] : memref<1x128xf32, #tpu.memory_space<vmem>>, vector<1x128xf32>
    %16 = vector.broadcast %15 : vector<1x128xf32> to vector<8x128xf32>
    %17 = arith.addf %14, %16 : vector<8x128xf32>
    %18 = arith.negf %17 : vector<8x128xf32>
    %19 = math.exp %18 : vector<8x128xf32>
    %cst_11 = arith.constant 1.000000e+00 : f32
    %20 = vector.broadcast %cst_11 : f32 to vector<8x128xf32>
    %21 = arith.addf %20, %19 : vector<8x128xf32>
    %22 = arith.divf %20, %21 : vector<8x128xf32>
    %23 = arith.truncf %22 : vector<8x128xf32> to vector<8x128xbf16>
    %c0_12 = arith.constant 0 : index
    %c0_13 = arith.constant 0 : index
    %24 = vector.load %arg6[%c0_12, %c0_13] : memref<128x64xbf16, #tpu.memory_space<vmem>>, vector<128x64xbf16>
    %cst_14 = arith.constant dense<0.000000e+00> : vector<8x64xf32>
    %25 = tpu.matmul %23, %24, %cst_14 {dimension_numbers = #tpu.dot_dimension_numbers<[1], [0], [0], [1], [0, 0, 1, 1], [], []>} : vector<8x128xbf16>, vector<128x64xbf16>, vector<8x64xf32> -> vector<8x64xf32>
    %c0_15 = arith.constant 0 : index
    %c0_16 = arith.constant 0 : index
    %26 = vector.load %arg7[%c0_15, %c0_16] : memref<1x64xf32, #tpu.memory_space<vmem>>, vector<1x64xf32>
    %27 = vector.broadcast %26 : vector<1x64xf32> to vector<8x64xf32>
    %28 = arith.addf %25, %27 : vector<8x64xf32>
    %29 = arith.negf %28 : vector<8x64xf32>
    %30 = math.exp %29 : vector<8x64xf32>
    %cst_17 = arith.constant 1.000000e+00 : f32
    %31 = vector.broadcast %cst_17 : f32 to vector<8x64xf32>
    %32 = arith.addf %31, %30 : vector<8x64xf32>
    %33 = arith.divf %31, %32 : vector<8x64xf32>
    %c0_18 = arith.constant 0 : index
    %c0_19 = arith.constant 0 : index
    %34 = vector.load %arg8[%c0_18, %c0_19] : memref<8x64xf32, #tpu.memory_space<vmem>>, vector<8x64xf32>
    tpu.vector_store %arg8[%c0_18, %c0_19], %33 {strides = array<i32>} : memref<8x64xf32, #tpu.memory_space<vmem>>, vector<8x64xf32>,
    return
  }
  func.func @transform_0(%arg0: i32) -> (i32, i32) {
    %c0_i32 = arith.constant 0 : i32
    %c0_i32_0 = arith.constant 0 : i32
    return %arg0, %c0_i32 : i32, i32
  }
  func.func @transform_1(%arg0: i32) -> (i32, i32) {
    %c0_i32 = arith.constant 0 : i32
    %c0_i32_0 = arith.constant 0 : i32
    %c0_i32_1 = arith.constant 0 : i32
    return %c0_i32, %c0_i32_0 : i32, i32
  }
  func.func @transform_2(%arg0: i32) -> (i32, i32) {
    %c0_i32 = arith.constant 0 : i32
    %c0_i32_0 = arith.constant 0 : i32
    %c0_i32_1 = arith.constant 0 : i32
    return %c0_i32, %c0_i32_0 : i32, i32
  }
  func.func @transform_3(%arg0: i32) -> (i32, i32) {
    %c0_i32 = arith.constant 0 : i32
    %c0_i32_0 = arith.constant 0 : i32
    %c0_i32_1 = arith.constant 0 : i32
    return %c0_i32, %c0_i32_0 : i32, i32
  }
  func.func @transform_4(%arg0: i32) -> (i32, i32) {
    %c0_i32 = arith.constant 0 : i32
    %c0_i32_0 = arith.constant 0 : i32
    %c0_i32_1 = arith.constant 0 : i32
    return %c0_i32, %c0_i32_0 : i32, i32
  }
  func.func @transform_5(%arg0: i32) -> (i32, i32) {
    %c0_i32 = arith.constant 0 : i32
    %c0_i32_0 = arith.constant 0 : i32
    %c0_i32_1 = arith.constant 0 : i32
    return %c0_i32, %c0_i32_0 : i32, i32
  }
  func.func @transform_6(%arg0: i32) -> (i32, i32) {
    %c0_i32 = arith.constant 0 : i32
    %c0_i32_0 = arith.constant 0 : i32
    %c0_i32_1 = arith.constant 0 : i32
    return %c0_i32, %c0_i32_0 : i32, i32
  }
  func.func @transform_7(%arg0: i32) -> (i32, i32) {
    %c0_i32 = arith.constant 0 : i32
    %c0_i32_0 = arith.constant 0 : i32
    return %arg0, %c0_i32 : i32, i32
  }
}

</mosaic_0001>

<bundles_post_ra>
// kernel: tpu_custom_call.1
= control target key start
LH: loop header
LB: loop body
LE: loop exit
PB: predicated region body
PF: predicated region fallthrough
CT: control target
= control target key end

     0   :  { %12 = vsyncpa [#allocation3], 0  ;;  %s761_s0 = inlined_call_operand.vmem [shape: f32[8,32], index: 0, kind: input, shape index: {}]   ;;  %s762_s1 = inlined_call_operand.vmem [shape: bf16[32,256], index: 1, kind: input, shape index: {}]   ;;  %s763_s2 = inlined_call_operand.vmem [shape: f32[1,256], index: 2, kind: input, shape index: {}]   ;;  %s764_s3 = inlined_call_operand.hbm [shape: bf16[256,128], index: 3, kind: input, shape index: {}]   ;;  %s765_s4 = inlined_call_operand.vmem [shape: f32[1,128], index: 4, kind: input, shape index: {}]   ;;  %s766_s5 = inlined_call_operand.vmem [shape: bf16[128,64], index: 5, kind: input, shape index: {}]   ;;  %s767_s6 = inlined_call_operand.vmem [shape: f32[1,64], index: 6, kind: input, shape index: {}]   ;;  %s768_s7 = inlined_call_operand.hbm [shape: f32[8,64], index: 7, kind: output, shape index: {}]  }
   0x1   :  { %13 = vsyncpa [#allocation4], 0  ;;  %s642_s24 = smov [#allocation2]   ;;  %s594_s28 = scalar_lea.hbm %s764_s3, 2048 }
   0x2   :  { %s25_s25 = sshll.u32 %s642_s24, 4  ;;  %p595_p0 = scmp.ne.s32.totalorder %s764_s3, %s594_s28  ;;  %s26_s25 = int_to_ptr.vmem [resolvable:$true] %s25_s25 }
   0x3   :  { %p598_p1 = scmp.lt.u32.totalorder %s594_s28, %s764_s3 }
   0x5   :  { %p600_p2 = pnand %p598_p1, %p595_p0 }
   0x7   :  { %603 = shalt.err (!%p600_p2)
}
   0x8   :  { %s604_s10 = scalar_lea.vmem %s26_s25, 2048  ;;  %p609_p4 = scmp.lt.s32.totalorder %s26_s25, %s26_s25 }
   0x9   :  { %p605_p3 = scmp.ne.s32.totalorder %s26_s25, %s604_s10  ;;  %p610_p5 = scmp.lt.s32.totalorder %s604_s10, %s604_s10 }
   0xb   :  { %p611_p6 = por %p610_p5, %p609_p4 }
   0xd   :  { %p612_p7 = pnand %p611_p6, %p605_p3 }
   0xf   :  { %615 = shalt.err (!%p612_p7)
}
  0x10   :  { %s643_s11 = smov 64   ;;  %s644_s12 = smov 4  }
  0x11   :  { %31 = dma.hbm_to_vmem [thread:$0]  %s764_s3, 2048, %s26_s25, [#allocation3], %s643_s11, %s643_s11, %s644_s12  }
  0x12   :  { %638 = dma.done.wait [#allocation3], 2048  }
  0x13   :  { %639 = vsyncadd [#allocation3], 4294965248  ;;  %v645_v0 = vmov 0   ;;  %v548_v1 = vld [vmem:[%s762_s1 + $0x4] ss:$8 sps:$4 sm:$0xff]   ;;  %vm80_vm0 = vcmask 261120   ;;  %v50_v23 = vlaneseq }
  0x14   :  { %116 = vmatprep.mubr.bf16.mxu0 %v645_v0  ;;  %v550_v2 = vld [vmem:[%s762_s1] ss:$8 sps:$4 sm:$0xff]   ;;  %84 = vmatprep.subr.bf16.mxu0 %v548_v1  ;;  %v551_v3 = vld [vmem:[%s762_s1 + $0x14] ss:$8 sps:$4 sm:$0xff]   ;;  %v553_v4 = vld [vmem:[%s762_s1 + $0x10] ss:$8 sps:$4 sm:$0xff]  }
  0x15   :  { %85 = vmatpush1.bf16.msra.mxu0 %v550_v2  ;;  %v42_v5 = vld [vmem:[%s761_s0] sm:$0xff]  ;;  %v556_v9 = vld [vmem:[#allocation2 + $0x48] sm:$0xff]   ;;  %v558_v11 = vld [vmem:[#allocation2 + $0x50] sm:$0xff]   ;;  %v51_v24 = vshrl.u32 %v50_v23, 7  ;;  %v646_v47 = vmov 0.0   ;;  %vm647_vm1 = vmmov 0  }
  0x16   :  { %86 = vmatprep.subr.bf16.mxu0 %v551_v3  ;;  %v43_v6 = vpack.c.bf16 %v42_v5, %v42_v5  ;;  %v554_v7 = vld [vmem:[#allocation2 + $0x40] sm:$0xff]   ;;  %v557_v10 = vld [vmem:[#allocation2 + $0x8] sm:$0xff]   ;;  %v559_v12 = vld [vmem:[#allocation2 + $0x10] sm:$0xff]   ;;  %vm438_vm2 = vcmask 523264  }
  0x17   :  { %v555_v8 = vld [vmem:[#allocation2] sm:$0xff]   ;;  %490 = vmatprep.subr.bf16.mxu1 %v554_v7  ;;  %v560_v13 = vld [vmem:[#allocation2 + $0x58] sm:$0xff]   ;;  %v564_v17 = vld [vmem:[#allocation2 + $0x68] sm:$0xff]   ;;  %v52_v25 = vsub.s32 0, %v51_v24  ;;  %v56_v27 = vsub.s32 1, %v51_v24 }
  0x18   :  { %491 = vmatpush3.bf16.msra.mxu1 %v555_v8  ;;  %v561_v14 = vld [vmem:[#allocation2 + $0x18] sm:$0xff]   ;;  %v562_v15 = vld [vmem:[#allocation2 + $0x60] sm:$0xff]   ;;  %v565_v18 = vld [vmem:[#allocation2 + $0x28] sm:$0xff]  }
  0x19   :  { %87 = vmatpush1.bf16.msra.mxu0 %v553_v4  ;;  %492 = vmatprep.subr.bf16.mxu1 %v556_v9  ;;  %v563_v16 = vld [vmem:[#allocation2 + $0x20] sm:$0xff]   ;;  %v566_v19 = vld [vmem:[#allocation2 + $0x70] sm:$0xff]   ;;  %v568_v21 = vld [vmem:[#allocation2 + $0x78] sm:$0xff]  }
  0x1a   :  { %v567_v20 = vld [vmem:[#allocation2 + $0x30] sm:$0xff]   ;;  %v569_v22 = vld [vmem:[#allocation2 + $0x38] sm:$0xff]   ;;  %v48_v26 = vld [vmem:[%s763_s2] sm:$0x3]  ;;  %521 = vmatprep.subr.bf16.mxu0 %v646_v47 }
  0x1b   :  { %v53_v28 = vrot.slane %v48_v26, %v52_v25  ;;  %v57_v29 = vrot.slane %v48_v26, %v56_v27  ;;  %v570_v46 = vld [vmem:[%s766_s5] sm:$0xff]   ;;  %v571_v48 = vld [vmem:[%s766_s5 + $0x8] sm:$0xff]   ;;  %v572_v49 = vld [vmem:[%s766_s5 + $0x10] sm:$0xff]  }
  0x1c   :  { %459 = vmatmul.mubr.msk.bf16.vlgmr.msra.gmra.mrb[0].mxu0 %vm80_vm0, %v43_v6  ;;  %493 = vmatpush3.bf16.msra.mxu1 %v557_v10  ;;  %v573_v50 = vld [vmem:[%s766_s5 + $0x18] sm:$0xff]   ;;  %v574_v51 = vld [vmem:[%s766_s5 + $0x20] sm:$0xff]   ;;  %v575_v52 = vld [vmem:[%s766_s5 + $0x28] sm:$0xff]  }
  0x1d   :  { %494 = vmatprep.subr.bf16.mxu1 %v558_v11  ;;  %522 = vmatpush3.bf16.msra.mxu0 %v570_v46  ;;  %v576_v53 = vld [vmem:[%s766_s5 + $0x30] sm:$0xff]   ;;  %v577_v54 = vld [vmem:[%s766_s5 + $0x38] sm:$0xff]   ;;  %v462_v56 = vld [vmem:[%s765_s4] ss:$0 sm:$0xff]  ;;  %s648_s4 = smov [#allocation5]  }
  0x1e   :  { %523 = vmatprep.subr.bf16.mxu0 %v646_v47  ;;  %537 = vmatprep.mubr.msk.bf16.mxu0 %vm647_vm1, %v646_v47  ;;  %v480_v3 = vld [vmem:[%s767_s6] ss:$0 sm:$0xff]  ;;  %s446_s19 = sshll.u32 %s648_s4, 4  ;;  %s447_s19 = int_to_ptr.vmem [resolvable:$true] %s446_s19 }
  0x1f   :  { %s616_s20 = scalar_lea.vmem %s447_s19, 128  ;;  %p621_p9 = scmp.lt.s32.totalorder %s447_s19, %s447_s19 }
  0x20   :  { %495 = vmatpush3.bf16.msra.mxu1 %v559_v12  ;;  %p617_p8 = scmp.ne.s32.totalorder %s447_s19, %s616_s20  ;;  %p622_p10 = scmp.lt.s32.totalorder %s616_s20, %s616_s20 }
  0x21   :  { %496 = vmatprep.subr.bf16.mxu1 %v560_v13  ;;  %524 = vmatpush3.bf16.msra.mxu0 %v571_v48 }
  0x22   :  { %525 = vmatprep.subr.bf16.mxu0 %v646_v47  ;;  %p623_p11 = por %p622_p10, %p621_p9 }
  0x24   :  { %497 = vmatpush3.bf16.msra.mxu1 %v561_v14  ;;  %p624_p12 = pnand %p623_p11, %p617_p8 }
  0x25   :  { %498 = vmatprep.subr.bf16.mxu1 %v562_v15  ;;  %526 = vmatpush3.bf16.msra.mxu0 %v572_v49 }
  0x26   :  { %527 = vmatprep.subr.bf16.mxu0 %v646_v47 }
  0x28   :  { %499 = vmatpush3.bf16.msra.mxu1 %v563_v16 }
  0x29   :  { %500 = vmatprep.subr.bf16.mxu1 %v564_v17  ;;  %528 = vmatpush3.bf16.msra.mxu0 %v573_v50 }
  0x2a   :  { %529 = vmatprep.subr.bf16.mxu0 %v646_v47 }
  0x2c   :  { %501 = vmatpush3.bf16.msra.mxu1 %v565_v18 }
  0x2d   :  { %502 = vmatprep.subr.bf16.mxu1 %v566_v19  ;;  %530 = vmatpush3.bf16.msra.mxu0 %v574_v51 }
  0x2e   :  { %531 = vmatprep.subr.bf16.mxu0 %v646_v47 }
  0x30   :  { %503 = vmatpush3.bf16.msra.mxu1 %v567_v20 }
  0x31   :  { %504 = vmatprep.subr.bf16.mxu1 %v568_v21  ;;  %532 = vmatpush3.bf16.msra.mxu0 %v575_v52 }
  0x32   :  { %533 = vmatprep.subr.bf16.mxu0 %v646_v47 }
  0x34   :  { %505 = vmatpush3.bf16.msra.mxu1 %v569_v22 }
  0x35   :  { %534 = vmatpush3.bf16.msra.mxu0 %v576_v53 }
  0x36   :  { %535 = vmatprep.subr.bf16.mxu0 %v646_v47 }
  0x39   :  { %536 = vmatpush3.bf16.msra.mxu0 %v577_v54 }
  0xef   :  { %v118_v30 = vpop.f32.mrb[0].mxu0 }
  0xf0   :  { %v119_v31 = vadd.f32 %v118_v30, %v53_v28  ;;  %v120_v32 = vpop.f32.mrb[1].mxu0 }
  0xf1   :  { %v121_v33 = vadd.f32 %v120_v32, %v57_v29  ;;  %v122_v34 = vpop.f32.mrb[2].mxu0 }
  0xf2   :  { %v460_v35 = vmul.f32 -1.442695, %v119_v31  ;;  %v123_v36 = vpop.f32.mrb[3].mxu0 }
  0xf3   :  { %v461_v37 = vmul.f32 -1.442695, %v121_v33 }
  0xf4   :  { %578 = vpow2.f32 %v460_v35 }
  0xf5   :  { %580 = vpow2.f32 %v461_v37 }
  0xfe   :  { %v579_v38 = vpop.eup %578 }
  0xff   :  { %v581_v39 = vpop.eup %580  ;;  %v131_v40 = vadd.f32 1.0, %v579_v38 }
 0x100   :  { %v132_v41 = vadd.f32 1.0, %v581_v39 }
 0x101   :  { %582 = vrcp.f32 %v131_v40 }
 0x102   :  { %584 = vrcp.f32 %v132_v41 }
 0x10b   :  { %v583_v42 = vpop.eup %582 }
 0x10c   :  { %v585_v43 = vpop.eup %584  ;;  %v137_v45 = vpack.c.bf16 %v583_v42, %v583_v42 }
 0x10d   :  { %v138_v44 = vpack.c.bf16 %v585_v43, %v585_v43 }
 0x10f   :  { %306 = vmatprep.mubr.bf16.mxu1 %v138_v44 }
 0x110   :  { %307 = vmatmul.mubr.bf16.vlgmr.msra.gmra.mrb[0].mxu1 %v137_v45 }
 0x1e3   :  { %v506_v55 = vpop.f32.mrb[0].mxu1 }
 0x1e4   :  { %v507_v57 = vpop.f32.mrb[1].mxu1 }
 0x1e5   :  { %v508_v58 = vadd.f32 %v507_v57, %v506_v55  ;;  %v509_v59 = vpop.f32.mrb[2].mxu1 }
 0x1e6   :  { %v510_v60 = vpop.f32.mrb[3].mxu1 }
 0x1e7   :  { %v309_v61 = vadd.f32 %v508_v58, %v462_v56 }
 0x1e9   :  { %v479_v62 = vmul.f32 -1.442695, %v309_v61 }
 0x1eb   :  { %586 = vpow2.f32 %v479_v62 }
 0x1f5   :  { %v587_v63 = vpop.eup %586 }
 0x1f6   :  { %v317_v0 = vadd.f32 1.0, %v587_v63 }
 0x1f8   :  { %588 = vrcp.f32 %v317_v0 }
 0x202   :  { %v589_v1 = vpop.eup %588 }
 0x203   :  { %v320_v2 = vpack.c.bf16 %v589_v1, %v589_v1 }
 0x205   :  { %538 = vmatmul.mubr.bf16.vlgmr.msra.gmra.mrb[4].mxu0 %v320_v2 }
 0x2d8   :  { %v426_v4 = vpop.f32.mrb[4].mxu0 }
 0x2d9   :  { %v427_v5 = vadd.f32 %v480_v3, %v426_v4  ;;  %v539_v6 = vpop.f32.mrb[5].mxu0 }
 0x2da   :  { %v429_v7 = vpop.f32.mrb[6].mxu0 }
 0x2db   :  { %v489_v8 = vmul.f32 -1.442695, %v427_v5  ;;  %v540_v9 = vpop.f32.mrb[7].mxu0 }
 0x2dd   :  { %590 = vpow2.f32 %v489_v8 }
 0x2e7   :  { %v591_v10 = vpop.eup %590 }
 0x2e8   :  { %v435_v11 = vadd.f32 1.0, %v591_v10 }
 0x2ea   :  { %592 = vrcp.f32 %v435_v11 }
 0x2f4   :  { %v593_v12 = vpop.eup %592 }
 0x2f5   :  { %439 = vst.msk [vmem:[#allocation5] sm:$0xff] %vm438_vm2, %v593_v12 }
 0x2f6   :  { %627 = shalt.err (!%p624_p12)
}
 0x2f7   :  { %s628_s22 = scalar_lea.hbm %s768_s7, 128 }
 0x2f8   :  { %p629_p13 = scmp.ne.s32.totalorder %s768_s7, %s628_s22  ;;  %p632_p0 = scmp.lt.u32.totalorder %s628_s22, %s768_s7 }
 0x2fa   :  { %p634_p1 = pnand %p632_p0, %p629_p13 }
 0x2fc   :  { %637 = shalt.err (!%p634_p1)
}
 0x2fd   :  { %449 = dma.vmem_to_hbm [thread:$0]  %s447_s19, 128, %s768_s7, [#allocation4]  }
 0x2fe   :  { %640 = dma.done.wait [#allocation4], 128  }
 0x2ff   :  { %641 = vsyncadd [#allocation4], 4294967168 }
 0x300   :  { %453 = vsyncpa [#allocation3], 1 }
 0x301   :  { %454 = vsyncpa [#allocation4], 1 }

</bundles_post_ra>
